<compile_context>
chip_gen: v6e
topology: v6e:2x2x1
jax: 0.10.0
libtpu: 0.0.40
codegen_flags: <defaults>
</compile_context>

<pallas_src>
import functools
import math

import jax
import jax.numpy as jnp
import numpy as np
from jax.experimental import pallas as pl
from jax.experimental.pallas import tpu as pltpu


def _one_plus_elu(x):
    # 1 + elu(x)  ==  x + 1 for x > 0,  exp(x) for x <= 0   (alpha = 1)
    return jnp.where(x > 0, x + 1.0, jnp.exp(x))


def _pick_row_tile(n, target):
    """Largest multiple-of-8 divisor of n that is <= target (or n itself)."""
    if n <= target:
        return n
    best = 0
    for t in range(8, target + 1, 8):
        if n % t == 0:
            best = t
    return best if best > 0 else n  # fallback: full sequence (still correct)


def _kv_accum_kernel(k_ref, v_ref, m_ref, kv_ref, *, matmul_dtype):
    """Phase 1: KV[b] += sum_n (1+elu(K))*m (outer) V*m, accumulated over N tiles."""
    kstep = pl.program_id(1)

    @pl.when(kstep == 0)
    def _init():
        kv_ref[...] = jnp.zeros_like(kv_ref)

    m = m_ref[0].astype(jnp.float32)                        # (tk, 1)
    k = _one_plus_elu(k_ref[0].astype(jnp.float32)) * m     # (H, tk, D)
    v = v_ref[0].astype(jnp.float32) * m                    # (H, tk, Dv)

    # KV += einsum('htd,hte->hde')  (batched over heads, f32 accumulation)
    kv_ref[0] += jax.lax.dot_general(
        k.astype(matmul_dtype), v.astype(matmul_dtype),
        dimension_numbers=(((1,), (1,)), ((0,), (0,))),
        preferred_element_type=jnp.float32)


def _qkv_norm_kernel(q_ref, kv_ref, o_ref, *, matmul_dtype, inv_sqrt_d, eps):
    """Phase 2: out = (1+elu(Q)) @ KV, fused SimpleRMSNorm, for one Q tile."""
    q = _one_plus_elu(q_ref[0].astype(jnp.float32)).astype(matmul_dtype)   # (H, tq, D)
    kv = kv_ref[0].astype(matmul_dtype)                                    # (H, D, Dv)

    # out = einsum('htd,hde->hte')  (batched over heads, f32 accumulation)
    out = jax.lax.dot_general(
        q, kv,
        dimension_numbers=(((2,), (1,)), ((0,), (0,))),
        preferred_element_type=jnp.float32)                                # (H, tq, Dv)

    # SimpleRMSNorm: x / (||x||_2(last dim) / sqrt(num_head*head_dim) + eps)
    # Per-row reciprocal + broadcast multiply (cheap) instead of a full (tq, Dv) divide.
    ssq = jnp.sum(out * out, axis=-1, keepdims=True)         # (H, tq, 1)
    inv = 1.0 / (jnp.sqrt(ssq) * inv_sqrt_d + eps)           # (H, tq, 1), f32
    o_ref[0] = (out * inv).astype(o_ref.dtype)


def norm_self_attention(Q, K, V, mask, *, num_head, head_dim, eps=1e-8,
                        block_rows=None, matmul_dtype=None, vmem_limit_bytes=None):
    """Pallas implementation of NormSelfAttention.forward.

    Q, K: (B, H, N, D); V: (B, H, N, Dv); mask: (B, N). Returns (B, H, N, Dv).
    """
    B, H, N, D = Q.shape
    Dv = V.shape[-1]
    assert H == num_head and D == head_dim
    assert K.shape == (B, H, N, D)
    assert V.shape[:3] == (B, H, N)
    assert mask.shape == (B, N)

    if matmul_dtype is None:
        matmul_dtype = Q.dtype          # bf16 inputs -> bf16 MXU operands, f32 accumulate
    if block_rows is None:
        block_rows = 256                # conservative: fits v5e/v6e/v7x scoped VMEM

    tile = _pick_row_tile(N, block_rows)
    nk = N // tile
    nq = N // tile

    mask3 = mask.reshape(B, N, 1)       # tiny per-tile (tk, 1) block; negligible DMA

    # As in the module: SimpleRMSNorm is constructed with num_head*head_dim regardless
    # of Dv, while the L2 reduction runs over the per-head last dim.
    inv_sqrt_d = 1.0 / math.sqrt(float(num_head * head_dim))

    # ---- Phase 1: KV = einsum('bhnd,bhne->bhde', act(K)*m, V*m), f32, tiled over N ----
    kv = pl.pallas_call(
        functools.partial(_kv_accum_kernel, matmul_dtype=matmul_dtype),
        out_shape=jax.ShapeDtypeStruct((B, H, D, Dv), jnp.float32),
        grid_spec=pltpu.PrefetchScalarGridSpec(
            num_scalar_prefetch=0,
            grid=(B, nk),
            in_specs=[
                pl.BlockSpec((1, H, tile, D), lambda b, k: (b, 0, k, 0)),
                pl.BlockSpec((1, H, tile, Dv), lambda b, k: (b, 0, k, 0)),
                pl.BlockSpec((1, tile, 1), lambda b, k: (b, k, 0)),
            ],
            out_specs=pl.BlockSpec((1, H, D, Dv), lambda b, k: (b, 0, 0, 0)),
        ),
        compiler_params=pltpu.CompilerParams(
            dimension_semantics=("parallel", "arbitrary"),
            vmem_limit_bytes=vmem_limit_bytes),
    )(K, V, mask3)

    # ---- Phase 2: out = act(Q) @ KV, fused RMSNorm, tiled over N ----
    out = pl.pallas_call(
        functools.partial(_qkv_norm_kernel, matmul_dtype=matmul_dtype,
                          inv_sqrt_d=inv_sqrt_d, eps=eps),
        out_shape=jax.ShapeDtypeStruct((B, H, N, Dv), Q.dtype),
        grid_spec=pltpu.PrefetchScalarGridSpec(
            num_scalar_prefetch=0,
            grid=(B, nq),
            in_specs=[
                pl.BlockSpec((1, H, tile, D), lambda b, q: (b, 0, q, 0)),
                pl.BlockSpec((1, H, D, Dv), lambda b, q: (b, 0, 0, 0)),
            ],
            out_specs=pl.BlockSpec((1, H, tile, Dv), lambda b, q: (b, 0, q, 0)),
        ),
        compiler_params=pltpu.CompilerParams(
            dimension_semantics=("parallel", "parallel"),
            vmem_limit_bytes=vmem_limit_bytes),
    )(Q, kv)

    return out


def _reference(Q, K, V, mask, num_head, head_dim, eps=1e-8):
    """Pure-JAX reference mirroring the PyTorch module."""
    Qa = _one_plus_elu(Q)
    Ka = _one_plus_elu(K) * mask[:, None, :, None]
    Vm = V * mask[:, None, :, None]
    KV = jnp.einsum('bhnd,bhne->bhde', Ka, Vm)
    out = jnp.einsum('bhde,bhnd->bhne', KV, Qa)
    d = num_head * head_dim
    norm_x = jnp.linalg.norm(out, axis=-1, keepdims=True)
    rms_x = norm_x * (d ** -0.5)
    return out / (rms_x + eps)


if __name__ == "__main__":
    # Small shapes consistent with the module; N=64 with block_rows=32 exercises the
    # multi-tile KV accumulation and the tiled Q@KV phase.
    B, H, N, D = 2, 2, 64, 16
    key = jax.random.PRNGKey(0)
    kq, kk, kv_key = jax.random.split(key, 3)
    Q = jax.random.normal(kq, (B, H, N, D), dtype=jnp.float32)
    K = jax.random.normal(kk, (B, H, N, D), dtype=jnp.float32)
    V = jax.random.normal(kv_key, (B, H, N, D), dtype=jnp.float32)
    # Deterministic padding-style mask: last 5 positions of each sequence masked out.
    mask = jnp.concatenate(
        [jnp.ones((B, N - 5), jnp.float32), jnp.zeros((B, 5), jnp.float32)], axis=-1)

    # f32 path (matmul operands keep the input dtype) — tight check vs f32 reference.
    out = norm_self_attention(Q, K, V, mask, num_head=H, head_dim=D, block_rows=32)
    out = jax.block_until_ready(out)
    ref = _reference(Q, K, V, mask, H, D)
    np.testing.assert_allclose(np.asarray(out), np.asarray(ref), rtol=1e-5, atol=1e-5)

    # bf16 path (bf16 MXU operands, f32 accumulation) — loose check vs f32 reference.
    out_bf16 = norm_self_attention(
        Q.astype(jnp.bfloat16), K.astype(jnp.bfloat16), V.astype(jnp.bfloat16), mask,
        num_head=H, head_dim=D, block_rows=32)
    out_bf16 = jax.block_until_ready(out_bf16)
    np.testing.assert_allclose(np.asarray(out_bf16).astype(np.float32), np.asarray(ref),
                               rtol=5e-2, atol=5e-2)

    print("KERNEL_OK")
</pallas_src>

<mosaic_0001>
module attributes {stable_mosaic.version = 11 : i64} {
  func.func @_kv_accum_kernel(%arg0: i32, %arg1: i32, %arg2: memref<1x2x32x16xf32, #tpu.memory_space<vmem>>, %arg3: memref<1x2x32x16xf32, #tpu.memory_space<vmem>>, %arg4: memref<1x32x1xf32, #tpu.memory_space<vmem>>, %arg5: memref<1x2x16x16xf32, #tpu.memory_space<vmem>>) attributes {dimension_semantics = [#tpu.dimension_semantics<parallel>, #tpu.dimension_semantics<arbitrary>], iteration_bounds = array<i64: 2, 2>, scalar_prefetch = 0 : i64, scratch_operands = 0 : i64, tpu.core_type = #tpu.core_type<tc>, window_params = [{transform_indices = @transform_0, window_bounds = array<i64: 1, 2, 32, 16>}, {transform_indices = @transform_1, window_bounds = array<i64: 1, 2, 32, 16>}, {transform_indices = @transform_2, window_bounds = array<i64: 1, 32, 1>}, {transform_indices = @transform_3, window_bounds = array<i64: 1, 2, 16, 16>}]} {
    %c0_i32 = arith.constant 0 : i32
    %0 = arith.cmpi eq, %arg1, %c0_i32 : i32
    %1 = arith.extui %0 : i1 to i32
    %c0_i32_0 = arith.constant 0 : i32
    %2 = arith.cmpi ne, %1, %c0_i32_0 : i32
    scf.if %2 {
      %cst_21 = arith.constant 0.000000e+00 : f32
      %28 = vector.broadcast %cst_21 : f32 to vector<1x2x16x16xf32>
      %c0_22 = arith.constant 0 : index
      %c0_23 = arith.constant 0 : index
      %c0_24 = arith.constant 0 : index
      %c0_25 = arith.constant 0 : index
      %29 = vector.load %arg5[%c0_22, %c0_23, %c0_24, %c0_25] : memref<1x2x16x16xf32, #tpu.memory_space<vmem>>, vector<1x2x16x16xf32>
      tpu.vector_store %arg5[%c0_22, %c0_23, %c0_24, %c0_25], %28 {strides = array<i32>} : memref<1x2x16x16xf32, #tpu.memory_space<vmem>>, vector<1x2x16x16xf32>,
    } else {
    }
    %c0 = arith.constant 0 : index
    %c0_1 = arith.constant 0 : index
    %c0_2 = arith.constant 0 : index
    %3 = vector.load %arg4[%c0, %c0_1, %c0_2] : memref<1x32x1xf32, #tpu.memory_space<vmem>>, vector<1x32x1xf32>
    %4 = vector.shape_cast %3 : vector<1x32x1xf32> to vector<32x1xf32>
    %c0_3 = arith.constant 0 : index
    %c0_4 = arith.constant 0 : index
    %c0_5 = arith.constant 0 : index
    %c0_6 = arith.constant 0 : index
    %5 = vector.load %arg2[%c0_3, %c0_4, %c0_5, %c0_6] : memref<1x2x32x16xf32, #tpu.memory_space<vmem>>, vector<1x2x32x16xf32>
    %6 = vector.shape_cast %5 : vector<1x2x32x16xf32> to vector<2x32x16xf32>
    %cst = arith.constant 0.000000e+00 : f32
    %7 = vector.broadcast %cst : f32 to vector<2x32x16xf32>
    %8 = arith.cmpf ogt, %6, %7 : vector<2x32x16xf32>
    %cst_7 = arith.constant 1.000000e+00 : f32
    %9 = vector.broadcast %cst_7 : f32 to vector<2x32x16xf32>
    %10 = arith.addf %6, %9 : vector<2x32x16xf32>
    %11 = math.exp %6 : vector<2x32x16xf32>
    %12 = arith.select %8, %10, %11 : vector<2x32x16xi1>, vector<2x32x16xf32>
    %13 = vector.shape_cast %4 : vector<32x1xf32> to vector<1x32x1xf32>
    %14 = vector.broadcast %13 : vector<1x32x1xf32> to vector<2x32x16xf32>
    %15 = arith.mulf %12, %14 : vector<2x32x16xf32>
    %c0_8 = arith.constant 0 : index
    %c0_9 = arith.constant 0 : index
    %c0_10 = arith.constant 0 : index
    %c0_11 = arith.constant 0 : index
    %16 = vector.load %arg3[%c0_8, %c0_9, %c0_10, %c0_11] : memref<1x2x32x16xf32, #tpu.memory_space<vmem>>, vector<1x2x32x16xf32>
    %17 = vector.shape_cast %16 : vector<1x2x32x16xf32> to vector<2x32x16xf32>
    %18 = vector.shape_cast %4 : vector<32x1xf32> to vector<1x32x1xf32>
    %19 = vector.broadcast %18 : vector<1x32x1xf32> to vector<2x32x16xf32>
    %20 = arith.mulf %17, %19 : vector<2x32x16xf32>
    %c0_12 = arith.constant 0 : index
    %c0_13 = arith.constant 0 : index
    %c0_14 = arith.constant 0 : index
    %c0_15 = arith.constant 0 : index
    %21 = vector.load %arg5[%c0_12, %c0_13, %c0_14, %c0_15] : memref<1x2x16x16xf32, #tpu.memory_space<vmem>>, vector<1x2x16x16xf32>
    %22 = vector.shape_cast %21 : vector<1x2x16x16xf32> to vector<2x16x16xf32>
    %cst_16 = arith.constant dense<0.000000e+00> : vector<2x16x16xf32>
    %23 = tpu.matmul %15, %20, %cst_16 {dimension_numbers = #tpu.dot_dimension_numbers<[1], [1], [2], [2], [0, 0, 0, 2, 1, 2], [0], [0]>} : vector<2x32x16xf32>, vector<2x32x16xf32>, vector<2x16x16xf32> -> vector<2x16x16xf32>
    %24 = arith.addf %22, %23 : vector<2x16x16xf32>
    %c0_17 = arith.constant 0 : index
    %c0_18 = arith.constant 0 : index
    %c0_19 = arith.constant 0 : index
    %c0_20 = arith.constant 0 : index
    %25 = vector.load %arg5[%c0_17, %c0_18, %c0_19, %c0_20] : memref<1x2x16x16xf32, #tpu.memory_space<vmem>>, vector<1x2x16x16xf32>
    %26 = vector.shape_cast %25 : vector<1x2x16x16xf32> to vector<2x16x16xf32>
    %27 = vector.shape_cast %24 : vector<2x16x16xf32> to vector<1x2x16x16xf32>
    tpu.vector_store %arg5[%c0_17, %c0_18, %c0_19, %c0_20], %27 {strides = array<i32>} : memref<1x2x16x16xf32, #tpu.memory_space<vmem>>, vector<1x2x16x16xf32>,
    return
  }
  func.func @transform_0(%arg0: i32, %arg1: i32) -> (i32, i32, i32, i32) {
    %c0_i32 = arith.constant 0 : i32
    %c0_i32_0 = arith.constant 0 : i32
    %c0_i32_1 = arith.constant 0 : i32
    return %arg0, %c0_i32, %arg1, %c0_i32_0 : i32, i32, i32, i32
  }
  func.func @transform_1(%arg0: i32, %arg1: i32) -> (i32, i32, i32, i32) {
    %c0_i32 = arith.constant 0 : i32
    %c0_i32_0 = arith.constant 0 : i32
    %c0_i32_1 = arith.constant 0 : i32
    return %arg0, %c0_i32, %arg1, %c0_i32_0 : i32, i32, i32, i32
  }
  func.func @transform_2(%arg0: i32, %arg1: i32) -> (i32, i32, i32) {
    %c0_i32 = arith.constant 0 : i32
    %c0_i32_0 = arith.constant 0 : i32
    return %arg0, %arg1, %c0_i32 : i32, i32, i32
  }
  func.func @transform_3(%arg0: i32, %arg1: i32) -> (i32, i32, i32, i32) {
    %c0_i32 = arith.constant 0 : i32
    %c0_i32_0 = arith.constant 0 : i32
    %c0_i32_1 = arith.constant 0 : i32
    %c0_i32_2 = arith.constant 0 : i32
    return %arg0, %c0_i32, %c0_i32_0, %c0_i32_1 : i32, i32, i32, i32
  }
}

</mosaic_0001>

<bundles_post_ra>
// kernel: tpu_custom_call.1
= control target key start
LH: loop header
LB: loop body
LE: loop exit
PB: predicated region body
PF: predicated region fallthrough
CT: control target
= control target key end

     0   :  { %s1396_s0 = inlined_call_operand.vmem [shape: f32[2,2,64,16], index: 0, kind: input, shape index: {}]   ;;  %s1397_s1 = inlined_call_operand.vmem [shape: f32[2,2,64,16], index: 1, kind: input, shape index: {}]   ;;  %s1398_s2 = inlined_call_operand.vmem [shape: f32[2,64,1], index: 2, kind: input, shape index: {}]   ;;  %s1399_s3 = inlined_call_operand.hbm [shape: f32[2,2,16,16], index: 3, kind: output, shape index: {}]  }
   0x1   :  { %1401 = sst [smem:[#allocation8_spill]] %s1396_s0 }
   0x2   :  { %1402 = sst [smem:[#allocation9_spill]] %s1397_s1 }
   0x3   :  { %8 = vsyncpa [#allocation5], 0 }
   0x4   :  { %10 = vsyncpa [#allocation5 + $0x1], 0  ;;  %s1164_s12 = smov 0   ;;  %s1166_s13 = smov 0  }
   0x5   :  { %s1168_s14 = smov 0   ;;  %s1170_s15 = smov 0  }
   0x6   :  { %s1172_s16 = smov 0   ;;  %s1174_s17 = smov 0  }
   0x7   :  { %s1176_s18 = smov 0   ;;  %s1178_s19 = smov 0  }
   0x8   :  { %s1180_s20 = smov 0   ;;  %s1182_s21 = smov 0  }
   0x9 LB: > { %s855_s22 = sadd.s32 4294967295, %s1137_s21   ;;  %s856_s23 = sadd.s32 4294967294, %s1137_s21   ;;  %s1137_s21 = sphi %s1182_s21, %s16_s21   ;;  %s1133_s20 = sphi %s1180_s20, %s1418_s20   ;;  %s1129_s19 = sphi %s1178_s19, %s1417_s19   ;;  %s1125_s18 = sphi %s1176_s18, %s1416_s18   ;;  %s1121_s17 = sphi %s1174_s17, %s1415_s17   ;;  %s1117_s16 = sphi %s1172_s16, %s1414_s16   ;;  %s1113_s15 = sphi %s1170_s15, %s1413_s15   ;;  %s1109_s14 = sphi %s1168_s14, %s1412_s14   ;;  %s1105_s13 = sphi %s1166_s13, %s1411_s13   ;;  %s1101_s12 = sphi %s1164_s12, %s1410_s12  }
   0xa   : > { %s25_s24 = sadd.s32 1, %s1129_s19  ;;  %s28_s25 = sadd.s32 1, %s1133_s20 }
   0xb   : > { %p26_p0 = scmp.ge.s32.totalorder %s25_s24, 2  ;;  %s37_s26 = sadd.s32 1, %s1117_s16 }
   0xc   : > { %p44_p1 = scmp.ne.s32.totalorder %s1117_s16, %s1113_s15  ;;  %p45_p2 = scmp.eq.s32.totalorder %s1137_s21, 0 }
   0xd   : > { %s1420_s24 = smov (%p26_p0, %s25_s24), 0  ;;  %s1422_s25 = smov (!%p26_p0, %s28_s25), %s1133_s20 }
   0xe   : > { %s33_s27 = ssub.s32 %s1129_s19, %s1420_s24  ;;  %p1227_p3 = por %p45_p2, %p44_p1 }
   0xf   : > { %p30_p4 = scmp.ge.s32.totalorder %s1422_s25, 2  ;;  %s119_s29 = sadd.s32 1, %s1109_s14 }
  0x10   : > { %p129_p5 = scmp.ne.s32.totalorder %s1109_s14, %s1105_s13  ;;  %p130_p6 = scmp.eq.s32.totalorder %s855_s22, 3 }
  0x11   : > { %s1424_s25 = smov (%p30_p4, %s1422_s25), 0  ;;  %p135_p8 = scmp.ne.s32.totalorder %s1105_s13, %s1101_s12 }
  0x12   : > { %1404 = sst [smem:[#allocation7_spill]] %s1424_s25  ;;  %p1236_p7 = por %p130_p6, %p129_p5 }
  0x13   : > { %s32_s4 = ssub.s32 %s1133_s20, %s1424_s25  ;;  %p136_p9 = scmp.eq.s32.totalorder %s856_s23, 3 }
  0x14   : > { %s34_s5 = sor.u32 %s33_s27, %s32_s4  ;;  %p117_p10 = scmp.eq.s32.totalorder %s32_s4, 0 }
  0x15   : > { %p35_p11 = scmp.eq.s32.totalorder %s34_s5, 0  ;;  %p1244_p12 = por %p136_p9, %p135_p8 }
  0x16   : > { %s1249_s7 = scalar_select %p117_p10, %s1109_s14, %s119_s29  }
  0x17   : > { %s1252_s8 = scalar_select %p35_p11, %s1117_s16, %s37_s26  }
  0x18   : > { %p858_p13 = scmp.ge.s32.totalorder %s1137_s21, 4 }
  0x1a   : > { %152 = sbr.rel (%p858_p13) target bundleno = 59 (0x3b), region = 16 }
  0x1f   : > { %155 = sbr.rel (!%p1227_p3) target bundleno = 45 (0x2d), region = 20  ;;  %s157_s9 = sand.u32 (%p1227_p3), 1, %s1117_s16  }
  0x20   : > { %s860_s10 = sshll.u32 (%p1227_p3), %s1129_s19, 2  ;;  %s859_s11 = sshll.u32 (%p1227_p3), %s157_s9, 6 }
  0x21   : > { %s861_s22 = sshll.u32 (%p1227_p3), %s1133_s20, 4  ;;  %s1407_s0 = sld [smem:[#allocation8_spill]] (%p1227_p3) }
  0x22   : > { %s162_s23 = sadd.s32 (%p1227_p3), %s861_s22, %s860_s10  ;;  %s159_s5 = scalar_lea.vmem (%p1227_p3), [#allocation2], %s859_s11 }
  0x23   : > { %s862_s27 = sshll.u32 (%p1227_p3), %s162_s23, 3 }
  0x27   : > { %s164_s26 = scalar_lea.vmem %s1407_s0, %s862_s27 }
  0x28   : > { %v207_v0 = vld [vmem:[%s164_s26] sm:$0xff]  ;;  %v209_v1 = vld [vmem:[%s164_s26 + $0x8] sm:$0xff]  ;;  %v211_v2 = vld [vmem:[%s164_s26 + $0x10] sm:$0xff] }
  0x29   : > { %208 = vst [vmem:[%s159_s5] sm:$0xff] %v207_v0  ;;  %210 = vst [vmem:[%s159_s5 + $0x8] sm:$0xff] %v209_v1  ;;  %v213_v3 = vld [vmem:[%s164_s26 + $0x18] sm:$0xff]  ;;  %v215_v4 = vld [vmem:[%s164_s26 + $0x40] sm:$0xff] }
  0x2a   : > { %212 = vst [vmem:[%s159_s5 + $0x10] sm:$0xff] %v211_v2  ;;  %v217_v5 = vld [vmem:[%s164_s26 + $0x48] sm:$0xff]  ;;  %214 = vst [vmem:[%s159_s5 + $0x18] sm:$0xff] %v213_v3  ;;  %v219_v6 = vld [vmem:[%s164_s26 + $0x50] sm:$0xff] }
  0x2b   : > { %216 = vst [vmem:[%s159_s5 + $0x20] sm:$0xff] %v215_v4  ;;  %218 = vst [vmem:[%s159_s5 + $0x28] sm:$0xff] %v217_v5  ;;  %v221_v7 = vld [vmem:[%s164_s26 + $0x58] sm:$0xff] }
  0x2c   : > { %220 = vst [vmem:[%s159_s5 + $0x30] sm:$0xff] %v219_v6  ;;  %222 = vst [vmem:[%s159_s5 + $0x38] sm:$0xff] %v221_v7 }
  0x2d PF: > { %228 = sbr.rel (!%p1227_p3) target bundleno = 59 (0x3b), region = 58  ;;  %s230_s9 = sand.u32 (%p1227_p3), 1, %s1117_s16  }
  0x2e   : > { %s864_s10 = sshll.u32 (%p1227_p3), %s1129_s19, 2  ;;  %s863_s11 = sshll.u32 (%p1227_p3), %s230_s9, 6 }
  0x2f   : > { %s865_s22 = sshll.u32 (%p1227_p3), %s1133_s20, 4  ;;  %s1408_s1 = sld [smem:[#allocation9_spill]] (%p1227_p3) }
  0x30   : > { %s235_s23 = sadd.s32 (%p1227_p3), %s865_s22, %s864_s10  ;;  %s232_s26 = scalar_lea.vmem (%p1227_p3), [#allocation3], %s863_s11 }
  0x31   : > { %s866_s27 = sshll.u32 (%p1227_p3), %s235_s23, 3 }
  0x35   : > { %s237_s0 = scalar_lea.vmem %s1408_s1, %s866_s27 }
  0x36   : > { %v280_v8 = vld [vmem:[%s237_s0] sm:$0xff]  ;;  %v282_v9 = vld [vmem:[%s237_s0 + $0x8] sm:$0xff]  ;;  %v284_v10 = vld [vmem:[%s237_s0 + $0x10] sm:$0xff] }
  0x37   : > { %281 = vst [vmem:[%s232_s26] sm:$0xff] %v280_v8  ;;  %283 = vst [vmem:[%s232_s26 + $0x8] sm:$0xff] %v282_v9  ;;  %v286_v11 = vld [vmem:[%s237_s0 + $0x18] sm:$0xff]  ;;  %v288_v12 = vld [vmem:[%s237_s0 + $0x40] sm:$0xff] }
  0x38   : > { %285 = vst [vmem:[%s232_s26 + $0x10] sm:$0xff] %v284_v10  ;;  %v290_v13 = vld [vmem:[%s237_s0 + $0x48] sm:$0xff]  ;;  %287 = vst [vmem:[%s232_s26 + $0x18] sm:$0xff] %v286_v11  ;;  %v292_v14 = vld [vmem:[%s237_s0 + $0x50] sm:$0xff] }
  0x39   : > { %289 = vst [vmem:[%s232_s26 + $0x20] sm:$0xff] %v288_v12  ;;  %291 = vst [vmem:[%s232_s26 + $0x28] sm:$0xff] %v290_v13  ;;  %v294_v15 = vld [vmem:[%s237_s0 + $0x58] sm:$0xff] }
  0x3a   : > { %293 = vst [vmem:[%s232_s26 + $0x30] sm:$0xff] %v292_v14  ;;  %295 = vst [vmem:[%s232_s26 + $0x38] sm:$0xff] %v294_v15 }
  0x3b PF: > { %p867_p0 = scmp.ge.s32.totalorder %s1137_s21, 1  ;;  %p313_p1 = scmp.lt.s32.totalorder %s1137_s21, 5 }
  0x3d   : > { %p314_p2 = pnand %p867_p0, %p313_p1 }
  0x3e   : > { %s320_s28 = sand.u32 (!%p314_p2), 1, %s1113_s15   ;;  %s360_s5 = sand.u32 (!%p314_p2), 1, %s1105_s13  }
  0x3f   : > { %317 = sbr.rel (%p314_p2) target bundleno = 547 (0x223), region = 100  ;;  %s868_s9 = sshll.u32 (!%p314_p2), %s320_s28, 6 }
  0x40   : > { %s870_s0 = sshll.u32 (!%p314_p2), %s360_s5, 5  ;;  %s871_s10 = sshll.u32 (!%p314_p2), %s1121_s17, 2 }
  0x41   : > { %p366_p3 = scmp.lt.s32.totalorder (!%p314_p2), %s1125_s18, 1  ;;  %p368_p4 = scmp.lt.s32.totalorder (!%p314_p2), %s871_s10, 7 }
  0x42   : > { %s1283_s1 = scalar_lea.vmem (!%p314_p2), [#allocation2], %s868_s9  ;;  %s1285_s25 = scalar_lea.vmem (!%p314_p2), [#allocation3], %s868_s9 }
  0x43   : > { %s1287_s15 = scalar_lea.vmem (!%p314_p2), [#allocation4], %s870_s0  ;;  %p874_p5 = scmp.ne.s32.totalorder (!%p314_p2), %s1121_s17, 0 }
  0x44   : > { %s367_s11 = scalar_select %p366_p3, %s1125_s18, 1 }
  0x45   : > { %s1426_s10 = smov (!%p368_p4, %s871_s10), 7  ;;  %378 = sbr.rel (%p874_p5) target bundleno = 77 (0x4d), region = 112 }
  0x46   : > { %s872_s22 = sshll.u32 %s367_s11, 3 }
  0x47   : > { %s371_s23 = sadd.s32 %s872_s22, %s1426_s10 }
  0x48   : > { %s873_s27 = sshll.u32 %s371_s23, 3 }
  0x49   : > { %s373_s26 = scalar_lea.vmem %s1398_s2, %s873_s27 }
  0x4a   : > { %vm379_vm0 = vcmask 130048   ;;  %v1139_v16 = vmov 0.0  }
  0x4b   : > { %380 = vst.msk [vmem:[%s1287_s15] sm:$0xff] %vm379_vm0, %v1139_v16  ;;  %381 = vst.msk [vmem:[%s1287_s15 + $0x8] sm:$0xff] %vm379_vm0, %v1139_v16 }
  0x4c   : > { %382 = vst.msk [vmem:[%s1287_s15 + $0x10] sm:$0xff] %vm379_vm0, %v1139_v16  ;;  %383 = vst.msk [vmem:[%s1287_s15 + $0x18] sm:$0xff] %vm379_vm0, %v1139_v16 }
  0x4d PF: > { %v386_v17 = vld [vmem:[%s373_s26 + $0x10] sm:$0xff]  ;;  %v384_v18 = vld [vmem:[%s373_s26] sm:$0xff]  ;;  %v1140_v19 = vmov 0   ;;  %v387_v20 = vld [vmem:[%s373_s26 + $0x18] sm:$0xff]  ;;  %vm516_vm9 = vcmask 261120   ;;  %s734_s17 = sshll.u32 %s1287_s15, 4  ;;  %s1331_s17 = int_to_ptr.vmem [resolvable:$true] %s734_s17 }
  0x4e   : > { %1012 = vset.pattern.permute.xlu1 %v1140_v19  ;;  %1011 = vset.pattern.permute.xlu0 %v1140_v19  ;;  %v385_v21 = vld [vmem:[%s373_s26 + $0x8] sm:$0xff]  ;;  %v392_v22 = vld [vmem:[%s1283_s1 + $0x20] sm:$0xff]  ;;  %v390_v28 = vld [vmem:[%s1283_s1 + $0x10] sm:$0xff]  ;;  %vm715_vm10 = vcmask 130048   ;;  %s1029_s0 = scalar_lea.vmem %s1331_s17, 512  ;;  %s1141_s10 = smov [#allocation4]  }
  0x4f   : > { %448 = vperm.xlu1 %1012, %v386_v17   ;;  %438 = vperm.xlu0 %1011, %v384_v18   ;;  %v388_v23 = vld [vmem:[%s1283_s1] sm:$0xff]  ;;  %v420_v24 = vmul.f32 1.442695, %v392_v22  ;;  %v389_v26 = vld [vmem:[%s1283_s1 + $0x8] sm:$0xff]  ;;  %v394_v30 = vld [vmem:[%s1283_s1 + $0x30] sm:$0xff]  ;;  %v408_v39 = vadd.f32 1.0, %v392_v22  ;;  %p1030_p6 = scmp.ne.s32.totalorder %s1331_s17, %s1029_s0 }
  0x50   : > { %v412_v25 = vmul.f32 1.442695, %v388_v23  ;;  %v393_v27 = vld [vmem:[%s1283_s1 + $0x28] sm:$0xff]  ;;  %v414_v29 = vmul.f32 1.442695, %v389_v26  ;;  %v1301_v34 = vld [vmem:[%s1283_s1 + $0x18] sm:$0xff] }
  0x51   : > { %1013 = vpow2.f32 %v420_v24  ;;  %v422_v31 = vmul.f32 1.442695, %v393_v27  ;;  %v416_v32 = vmul.f32 1.442695, %v390_v28  ;;  %v424_v33 = vmul.f32 1.442695, %v394_v30  ;;  %p1031_p8 = pnand %p1030_p6, %p1236_p7 }
  0x52   : > { %1015 = vpow2.f32 %v412_v25  ;;  %v1304_v35 = vld [vmem:[%s1283_s1 + $0x38] sm:$0xff]  ;;  %v418_v36 = vmul.f32 1.442695, %v1301_v34  ;;  %v404_v40 = vadd.f32 1.0, %v388_v23  ;;  %vm400_vm1 = vcmp.gt.f32.partialorder %v392_v22, 0.0  ;;  %v466_v60 = vld [vmem:[%s1285_s25 + $0x10] sm:$0xff] }
  0x53   : > { %453 = vperm.xlu1 %1012, %v387_v20   ;;  %443 = vperm.xlu0 %1011, %v385_v21   ;;  %1017 = vpow2.f32 %v414_v29  ;;  %v426_v37 = vmul.f32 1.442695, %v1304_v35  ;;  %vm396_vm2 = vcmp.gt.f32.partialorder %v388_v23, 0.0  ;;  %v405_v45 = vadd.f32 1.0, %v389_v26  ;;  %v467_v58 = vld [vmem:[%s1285_s25 + $0x18] sm:$0xff]  ;;  %v470_v61 = vld [vmem:[%s1285_s25 + $0x30] sm:$0xff]  ;;  %p1032_p9 = pneg %p1031_p8 }
  0x54   : > { %1019 = vpow2.f32 %v422_v31  ;;  %v409_v46 = vadd.f32 1.0, %v393_v27  ;;  %vm397_vm3 = vcmp.gt.f32.partialorder %v389_v26, 0.0  ;;  %vm401_vm4 = vcmp.gt.f32.partialorder %v393_v27, 0.0  ;;  %v471_v59 = vld [vmem:[%s1285_s25 + $0x38] sm:$0xff]  ;;  %v465_v13 = vld [vmem:[%s1285_s25 + $0x8] sm:$0xff]  ;;  %v464_v16 = vld [vmem:[%s1285_s25] sm:$0xff] }
  0x55   : > { %1021 = vpow2.f32 %v416_v32  ;;  %v406_v51 = vadd.f32 1.0, %v390_v28  ;;  %v410_v52 = vadd.f32 1.0, %v394_v30  ;;  %vm398_vm5 = vcmp.gt.f32.partialorder %v390_v28, 0.0  ;;  %v469_v14 = vld [vmem:[%s1285_s25 + $0x28] sm:$0xff]  ;;  %v468_v17 = vld [vmem:[%s1285_s25 + $0x20] sm:$0xff]  ;;  %v483_v31 = vld [vmem:[%s1287_s15 + $0x18] sm:$0xff] }
  0x56   : > { %1023 = vpow2.f32 %v424_v33  ;;  %vm402_vm6 = vcmp.gt.f32.partialorder %v394_v30, 0.0  ;;  %v407_v11 = vadd.f32 1.0, %v1301_v34  ;;  %v411_v12 = vadd.f32 1.0, %v1304_v35  ;;  %v481_v30 = vld [vmem:[%s1287_s15 + $0x8] sm:$0xff]  ;;  %s884_s1 = sshll.u32 %s1125_s18, 9  ;;  %s1339_s18 = scalar_lea.sflag [#allocation5], %s360_s5 }
  0x57   : > { %1025 = vpow2.f32 %v418_v36  ;;  %vm399_vm7 = vcmp.gt.f32.partialorder %v1301_v34, 0.0  ;;  %vm403_vm8 = vcmp.gt.f32.partialorder %v1304_v35, 0.0  ;;  %v480_v34 = vld [vmem:[%s1287_s15] sm:$0xff]  ;;  %v482_v35 = vld [vmem:[%s1287_s15 + $0x10] sm:$0xff]  ;;  %s1329_s9 = scalar_lea.hbm %s1399_s3, %s884_s1  ;;  %s1033_s11 = sshll.u32 %s1141_s10, 4  ;;  %s1034_s11 = int_to_ptr.vmem [resolvable:$false] %s1033_s11 }
  0x58   : > { %1027 = vpow2.f32 %v426_v37  ;;  %s1035_s22 = scalar_lea.vmem %s1034_s11, 1024  ;;  %p1036_p10 = scmp.lt.s32.totalorder %s1331_s17, %s1034_s11 }
  0x59   : > { %p1037_p11 = scmp.lt.s32.totalorder %s1035_s22, %s1029_s0 }
  0x5b   : > { %p1038_p13 = por %p1037_p11, %p1036_p10 }
  0x5d   : > { %p1039_p0 = pnand %p1038_p13, %p1032_p9 }
  0x5e   : > { %v1014_v38 = vpop.eup %1013 }
  0x5f   : > { %v1016_v41 = vpop.eup %1015  ;;  %v432_v43 = vsel %vm400_vm1, %v408_v39, %v1014_v38 }
  0x60   : > { %v1018_v42 = vpop.eup %1017  ;;  %v428_v44 = vsel %vm396_vm2, %v404_v40, %v1016_v41 }
  0x61   : > { %v1020_v47 = vpop.eup %1019  ;;  %v429_v56 = vsel %vm397_vm3, %v405_v45, %v1018_v42 }
  0x62   : > { %v1022_v50 = vpop.eup %1021  ;;  %v433_v57 = vsel %vm401_vm4, %v409_v46, %v1020_v47 }
  0x63   : > { %v1024_v55 = vpop.eup %1023  ;;  %v430_v0 = vsel %vm398_vm5, %v406_v51, %v1022_v50 }
  0x64   : > { %v434_v1 = vsel %vm402_vm6, %v410_v52, %v1024_v55  ;;  %v1026_v8 = vpop.eup %1025 }
  0x65   : > { %v1028_v15 = vpop.eup %1027  ;;  %v431_v20 = vsel %vm399_vm7, %v407_v11, %v1026_v8 }
  0x66   : > { %v435_v21 = vsel %vm403_vm8, %v411_v12, %v1028_v15 }
  0xca   : > { %v449_v48 = vpop.permute.xlu1 %448  ;;  %v439_v49 = vpop.permute.xlu0 %438 }
  0xcb   : > { %v460_v53 = vmul.f32 %v439_v49, %v432_v43  ;;  %v456_v54 = vmul.f32 %v439_v49, %v428_v44  ;;  %v474_v6 = vmul.f32 %v466_v60, %v449_v48  ;;  %v478_v7 = vmul.f32 %v470_v61, %v449_v48 }
  0xcc   : > { %v458_v9 = vmul.f32 %v449_v48, %v430_v0  ;;  %v462_v10 = vmul.f32 %v449_v48, %v434_v1  ;;  %v472_v22 = vmul.f32 %v464_v16, %v439_v49  ;;  %v476_v23 = vmul.f32 %v468_v17, %v439_v49 }
  0xcd   : > { %598 = vxpose.xlu1.b32.start [1/4] (short) (narrow) %v460_v53, 16  ;;  %484 = vxpose.xlu0.b32.start [1/4] (short) (narrow) %v456_v54, 16 }
  0xce   : > { %v454_v62 = vpop.permute.xlu1 %453  ;;  %v444_v63 = vpop.permute.xlu0 %443 }
  0xcf   : > { %v457_v2 = vmul.f32 %v444_v63, %v429_v56  ;;  %v461_v3 = vmul.f32 %v444_v63, %v433_v57  ;;  %v475_v4 = vmul.f32 %v467_v58, %v454_v62  ;;  %v479_v5 = vmul.f32 %v471_v59, %v454_v62 }
  0xd0   : > { %v473_v18 = vmul.f32 %v465_v13, %v444_v63  ;;  %v477_v19 = vmul.f32 %v469_v14, %v444_v63  ;;  %v459_v24 = vmul.f32 %v454_v62, %v431_v20  ;;  %v463_v25 = vmul.f32 %v454_v62, %v435_v21 }
  0xd1   : > { %599 = vxpose.xlu1.b32.cont [2/4] (short) (narrow) %v461_v3, 16  ;;  %485 = vxpose.xlu0.b32.cont [2/4] (short) (narrow) %v457_v2, 16 }
  0xd2   : > { %897 = vmatprep.subr.mxu0 %v475_v4  ;;  %908 = vmatprep.subr.mxu1 %v479_v5 }
  0xd3   : > { %898 = vmatpush3.msra.mxu0 %v475_v4  ;;  %909 = vmatpush3.msra.mxu1 %v479_v5 }
  0xd4   : > { %899 = vmatprep.subr.mxu0 %v474_v6  ;;  %910 = vmatprep.subr.mxu1 %v478_v7 }
  0xd5   : > { %900 = vmatpush3.msra.mxu0 %v474_v6  ;;  %911 = vmatpush3.msra.mxu1 %v478_v7 }
  0xd6   : > { %600 = vxpose.xlu1.b32.cont [3/4] (short) (narrow) %v462_v10, 16  ;;  %486 = vxpose.xlu0.b32.cont [3/4] (short) (narrow) %v458_v9, 16 }
  0xd7   : > { %901 = vmatprep.subr.mxu0 %v473_v18  ;;  %912 = vmatprep.subr.mxu1 %v477_v19 }
  0xd8   : > { %902 = vmatpush3.msra.mxu0 %v473_v18  ;;  %913 = vmatpush3.msra.mxu1 %v477_v19 }
  0xd9   : > { %903 = vmatprep.subr.mxu0 %v472_v22  ;;  %914 = vmatprep.subr.mxu1 %v476_v23 }
  0xda   : > { %904 = vmatpush3.msra.mxu0 %v472_v22  ;;  %915 = vmatpush3.msra.mxu1 %v476_v23 }
  0xdb   : > { %601 = vxpose.xlu1.b32.end [4/4] (short) (narrow) %v463_v25, 16  ;;  %487 = vxpose.xlu0.b32.end [4/4] (short) (narrow) %v459_v24, 16 }
 0x14b   : > { %v614_v26 = vpop.trf.xlu1  ;;  %v500_v27 = vpop.trf.xlu0 }
 0x14c   : > { %905 = vmatprep.mubr.msk.f32.mxu0 %vm516_vm9, %v500_v27  ;;  %916 = vmatprep.mubr.msk.f32.mxu1 %vm516_vm9, %v614_v26 }
 0x14f   : > { %v615_v28 = vpop.trf.xlu1  ;;  %v501_v29 = vpop.trf.xlu0 }
 0x150   : > { %906 = vmatmul.mubr.msk.f32.vlgmr.msra.gmra.mxu0 %vm516_vm9, %v501_v29  ;;  %917 = vmatmul.mubr.msk.f32.vlgmr.msra.gmra.mxu1 %vm516_vm9, %v615_v28 }
 0x210   : > { %v907_v32 = vpop.f32.mrf.mxu0  ;;  %v918_v33 = vpop.f32.mrf.mxu1 }
 0x211   : > { %v712_v36 = vadd.f32 %v907_v32, %v481_v30  ;;  %v714_v37 = vadd.f32 %v918_v33, %v483_v31 }
 0x212   : > { %v589_v38 = vpop.f32.mrf.mxu0  ;;  %v702_v39 = vpop.f32.mrf.mxu1 }
 0x213   : > { %717 = vst.msk [vmem:[%s1287_s15 + $0x8] sm:$0xff] %vm715_vm10, %v712_v36  ;;  %719 = vst.msk [vmem:[%s1287_s15 + $0x18] sm:$0xff] %vm715_vm10, %v714_v37  ;;  %v711_v40 = vadd.f32 %v589_v38, %v480_v34  ;;  %v713_v41 = vadd.f32 %v702_v39, %v482_v35 }
 0x215   : > { %716 = vst.msk [vmem:[%s1287_s15] sm:$0xff] %vm715_vm10, %v711_v40  ;;  %718 = vst.msk [vmem:[%s1287_s15 + $0x10] sm:$0xff] %vm715_vm10, %v713_v41 }
 0x216   : > { %1042 = shalt.err (!%p1039_p0)
}
 0x217   : > { %s1043_s5 = scalar_lea.hbm %s1329_s9, 512  ;;  %s1047_s4 = scalar_lea.hbm %s1399_s3, 1024 }
 0x218   : > { %p1044_p1 = scmp.ne.s32.totalorder %s1329_s9, %s1043_s5  ;;  %p1048_p4 = scmp.lt.s32.totalorder %s1329_s9, %s1399_s3 }
 0x219   : > { %p1049_p5 = scmp.lt.s32.totalorder %s1047_s4, %s1043_s5 }
 0x21a   : > { %p1045_p2 = pnand %p1044_p1, %p1236_p7 }
 0x21b   : > { %p1050_p6 = por %p1049_p5, %p1048_p4 }
 0x21c   : > { %p1046_p3 = pneg %p1045_p2 }
 0x21e   : > { %p1051_p8 = pnand %p1050_p6, %p1046_p3 }
 0x220   : > { %1054 = shalt.err (!%p1051_p8)
}
 0x221   : > { %s1142_s15 = smov 128   ;;  %s1143_s1 = smov 8  }
 0x222   : > { %919 = dma.vmem_to_hbm [thread:$0]  (%p1236_p7), %s1331_s17, 512, %s1329_s9, %s1339_s18, %s1142_s15, %s1142_s15, %s1143_s1  }
 0x223 PF: > { %p925_p9 = scmp.ge.s32.totalorder %s1137_s21, 2  ;;  %s749_s25 = sand.u32 1, %s1101_s12  }
 0x224   : > { %s750_s28 = scalar_lea.sflag [#allocation5], %s749_s25 }
 0x225   : > { %p922_p10 = pnand %p925_p9, %p1244_p12 }
 0x227   : > { %p923_p11 = pneg %p922_p10 }
 0x229   : > { %1096 = dma.done.wait (%p923_p11), %s750_s28, 512  }
 0x22a   : > { %1098 = vsyncadd (%p923_p11), %s750_s28, 4294966784  ;;  %s16_s21 = sadd.s32 1, %s1137_s21   ;;  %s1409_s30 = sld [smem:[#allocation7_spill]] }
 0x22b   : > { %p13_p13 = scmp.ge.s32.totalorder %s16_s21, 6   ;;  %s1410_s12 = smov %s1105_s13 }
 0x22c   : > { %s1411_s13 = smov %s1109_s14  ;;  %s1412_s14 = smov %s1249_s7 }
 0x22d   : > { %s1413_s15 = smov %s1117_s16  ;;  %s1414_s16 = smov %s1252_s8 }
 0x22e   : > { %s1415_s17 = smov %s1129_s19  ;;  %s1416_s18 = smov %s1133_s20 }
 0x22f   : > { %s1417_s19 = smov %s1420_s24  ;;  %15 = sbr.rel (!%p13_p13) target bundleno = 9 (0x9), region = 163 }
 0x230   : > { %s1418_s20 = smov %s1409_s30 }
 0x234   :  { %755 = vsyncpa [#allocation5], 1 }
 0x235   :  { %757 = vsyncpa [#allocation5 + $0x1], 1 }

</bundles_post_ra>
